<compile_context>
chip_gen: v7x
topology: tpu7x:2x2x1
jax: 0.10.0
libtpu: 0.0.40
codegen_flags: <defaults>
</compile_context>

<pallas_src>
import numpy as np
import jax
import jax.numpy as jnp
from jax import lax
from jax.experimental import pallas as pl
from jax.experimental.pallas import tpu as pltpu


def _round_up(x, m):
    return (x + m - 1) // m * m


def _make_fm_kernel(field_slices):
    """field_slices: static tuple of (row_start, padded_len) per field."""

    def kernel(idx_ref, tbl_ref, bias_ref, out_ref):
        """One batch tile of the FM forward pass.

        idx_ref : (F, TILE_B) int32  -- per-field padded-vocab row indices
        tbl_ref : (D+2, V_pad)       -- [emb ; sum_d emb^2 ; linear_w]^T (bf16)
        bias_ref: (1,)        f32    -- linear bias (SMEM scalar)
        out_ref : (1, TILE_B) f32    -- sigmoid(linear + fm), lane-dense
        """
        F, TB = idx_ref.shape
        DP2, VP = tbl_ref.shape
        D = DP2 - 2

        # Per-field one-hot slabs over that field's (disjoint, 8-row-aligned)
        # slice of the padded vocab.  int32 compares, f32 slabs -> one cast of
        # the finished mask to the table dtype (bf16) just before the MXU.
        slabs = []
        for f, (start, plen) in enumerate(field_slices):
            idx_f = idx_ref[f:f + 1, :]                              # (1, TB)
            local = idx_f - start                                    # (1, TB)
            iota_f = lax.broadcasted_iota(jnp.int32, (plen, TB), 0)  # (plen, TB)
            slabs.append((iota_f == local).astype(jnp.float32))
        multihot = jnp.concatenate(slabs, axis=0)                    # (VP, TB) f32
        multihot = multihot.astype(tbl_ref.dtype)                    # single cast

        # Single fused MXU matmul: (D+2, VP) @ (VP, TB) -> (D+2, TB), f32 acc.
        #   rows 0..D-1 : sum_f emb[idx_f]
        #   row  D      : sum_f ||emb[idx_f]||^2
        #   row  D+1    : sum_f lin_w[idx_f]
        gathered = jnp.dot(tbl_ref[...], multihot,
                           preferred_element_type=jnp.float32)       # (D+2, TB)

        sum_v = gathered[:D, :]                                      # (D, TB)
        sum_sq = gathered[D:D + 1, :]                                # (1, TB)
        lin = gathered[D + 1:D + 2, :]                               # (1, TB)

        # FM term: keep the near-cancelling subtraction in f32.
        square_of_sum = jnp.sum(sum_v * sum_v, axis=0, keepdims=True)
        fm = 0.5 * (square_of_sum - sum_sq)                          # (1, TB)
        logits = lin + bias_ref[0] + fm
        out_ref[...] = jax.nn.sigmoid(logits)

    return kernel


def build_fm_tables(emb_table, lin_table, field_dims,
                    *, table_dtype=jnp.bfloat16):
    """Precompute the fused, padded, transposed table ONCE (hoisted out of the
    per-call path).  Returns (fused_t, row_starts, field_slices)."""
    field_dims = tuple(int(d) for d in field_dims)
    V, D = emb_table.shape

    # Each field's vocab range padded to a multiple of 8 rows so the in-kernel
    # one-hot slabs are sublane-aligned.
    pad_lens = tuple(_round_up(d, 8) for d in field_dims)
    row_starts_np = np.concatenate(([0], np.cumsum(pad_lens)[:-1])).astype(np.int64)
    v_pad = int(np.sum(pad_lens))

    dst = np.concatenate([np.arange(d) + row_starts_np[f]
                          for f, d in enumerate(field_dims)]).astype(np.int32)
    dst = jnp.asarray(dst)

    emb_pad = jnp.zeros((v_pad, D), jnp.float32).at[dst].set(
        emb_table.astype(jnp.float32))
    lin_pad = jnp.zeros((v_pad, 1), jnp.float32).at[dst].set(
        lin_table.astype(jnp.float32))
    sq_rowsum = jnp.sum(emb_pad * emb_pad, axis=1, keepdims=True)    # (V_pad, 1)

    # (V_pad, D+2) -> transpose -> (D+2, V_pad); D=32 keeps the emb-row slice
    # of the matmul output sublane-aligned (pad D to 8 if that ever changes).
    fused_t = jnp.concatenate([emb_pad, sq_rowsum, lin_pad], axis=1).T
    fused_t = fused_t.astype(table_dtype)

    row_starts = jnp.asarray(row_starts_np, jnp.int32)
    field_slices = tuple((int(s), int(p)) for s, p in zip(row_starts_np, pad_lens))
    return fused_t, row_starts, field_slices


def fm_model_forward(x_idx, fused_t, row_starts, lin_bias, field_slices,
                     *, tile_b=512):
    """x_idx: (B, F) int32 raw per-field indices. Returns (B,) f32 probs."""
    B, F = x_idx.shape
    DP2, V_pad = fused_t.shape

    # 256-multiple tiles fill the 256-wide MXU on v6e/v7x; clamp so tiny
    # batches run as one fat step instead of wasting padded work.
    tile_b = int(min(tile_b, _round_up(B, 256)))
    b_pad = _round_up(B, tile_b)

    idx = x_idx.astype(jnp.int32) + row_starts[None, :]              # (B, F)
    if b_pad != B:
        idx = jnp.pad(idx, ((0, b_pad - B), (0, 0)))                 # pad rows -> idx 0
    idx_t = idx.T                                                    # (F, b_pad)

    grid = (b_pad // tile_b,)
    kernel = _make_fm_kernel(field_slices)

    out = pl.pallas_call(
        kernel,
        out_shape=jax.ShapeDtypeStruct((1, b_pad), jnp.float32),
        grid=grid,
        in_specs=[
            # per-field indices, tiled along the batch (lane) axis
            pl.BlockSpec((F, tile_b), lambda i: (0, i)),
            # fused table: constant block index -> DMA'd once, VMEM-resident
            # across the whole grid (see residency cutoff note at top).
            pl.BlockSpec((DP2, V_pad), lambda i: (0, 0)),
            # bias scalar in SMEM
            pl.BlockSpec(memory_space=pltpu.MemorySpace.SMEM),
        ],
        out_specs=pl.BlockSpec((1, tile_b), lambda i: (0, i)),
        compiler_params=pltpu.CompilerParams(
            dimension_semantics=("parallel",),     # shard batch across TCs (v7x)
            vmem_limit_bytes=32 * 1024 * 1024,     # explicit; ample for all gens
        ),
    )(idx_t, fused_t, lin_bias)

    return out[0, :B]


def _reference(x_idx, field_dims, emb_table, lin_table, lin_bias):
    offsets = jnp.asarray(np.concatenate(([0], np.cumsum(field_dims)[:-1])),
                          jnp.int32)
    idx = x_idx + offsets[None, :]                                   # (B, F)
    emb = emb_table[idx]                                             # (B, F, D)
    lin = jnp.sum(lin_table[idx], axis=(1, 2)) + lin_bias[0]         # (B,)
    sum_f = jnp.sum(emb, axis=1)
    sum_sq = jnp.sum(emb * emb, axis=1)
    fm = 0.5 * jnp.sum(sum_f * sum_f - sum_sq, axis=-1)              # (B,)
    return jax.nn.sigmoid(lin + fm)


if __name__ == "__main__":
    field_dims = (5, 7, 11, 13)        # per-field vocab sizes
    embed_dim = 32
    batch = 1024                       # 2 grid steps of TILE_B=512
    vocab = int(np.sum(field_dims))

    key = jax.random.PRNGKey(0)
    k_emb, k_lin, k_x = jax.random.split(key, 3)

    # Deterministic synthetic parameters (shapes match the nn.Embedding tables).
    emb_table = jax.random.normal(k_emb, (vocab, embed_dim), jnp.float32) * 0.1
    lin_table = jax.random.normal(k_lin, (vocab, 1), jnp.float32) * 0.1
    lin_bias = jnp.zeros((1,), jnp.float32)

    # Integer feature indices, one per field.
    cols = []
    for f, fd in enumerate(field_dims):
        kf = jax.random.fold_in(k_x, f)
        cols.append(jax.random.randint(kf, (batch,), 0, fd, dtype=jnp.int32))
    x = jnp.stack(cols, axis=1)        # (B, F) int32

    # Fused table built ONCE (would be cached alongside the weights in practice).
    fused_t, row_starts, field_slices = build_fm_tables(
        emb_table, lin_table, field_dims, table_dtype=jnp.bfloat16)

    out = fm_model_forward(x, fused_t, row_starts, lin_bias, field_slices)
    out = jax.block_until_ready(out)

    ref = _reference(x, field_dims, emb_table, lin_table, lin_bias)
    assert out.shape == (batch,)
    # bf16 table => expected |err| on the sigmoid output is ~1e-3; 2e-2 is a
    # comfortable bound while still being meaningful for probabilities.
    assert np.allclose(np.asarray(out), np.asarray(ref), rtol=0.0, atol=2e-2)

    print("KERNEL_OK")
</pallas_src>

<mosaic_0001>
module attributes {stable_mosaic.version = 11 : i64} {
  func.func @kernel(%arg0: i32, %arg1: memref<4x512xi32, #tpu.memory_space<vmem>>, %arg2: memref<34x48xbf16, #tpu.memory_space<vmem>>, %arg3: memref<1xf32, #tpu.memory_space<smem>>, %arg4: memref<1x512xf32, #tpu.memory_space<vmem>>) attributes {dimension_semantics = [#tpu.dimension_semantics<parallel>], iteration_bounds = array<i64: 2>, scalar_prefetch = 0 : i64, scratch_operands = 0 : i64, tpu.core_type = #tpu.core_type<tc>, window_params = [{transform_indices = @transform_0, window_bounds = array<i64: 4, 512>}, {pipeline_mode = #tpu.pipeline_mode<synchronous>, transform_indices = @transform_1, window_bounds = array<i64: 34, 48>}, {transform_indices = @transform_2, window_bounds = array<i64: 1>}, {transform_indices = @transform_3, window_bounds = array<i64: 1, 512>}]} {
    %c0 = arith.constant 0 : index
    %c0_0 = arith.constant 0 : index
    %0 = vector.load %arg1[%c0, %c0_0] : memref<4x512xi32, #tpu.memory_space<vmem>>, vector<1x512xi32>
    %c0_i32 = arith.constant 0 : i32
    %1 = vector.broadcast %c0_i32 : i32 to vector<1x512xi32>
    %2 = arith.subi %0, %1 : vector<1x512xi32>
    %3 = tpu.iota {dimensions = array<i32: 0>} : vector<8x512xi32>
    %4 = vector.broadcast %2 : vector<1x512xi32> to vector<8x512xi32>
    %5 = arith.cmpi eq, %3, %4 : vector<8x512xi32>
    %6 = arith.extui %5 : vector<8x512xi1> to vector<8x512xi32>
    %7 = arith.sitofp %6 : vector<8x512xi32> to vector<8x512xf32>
    %c1 = arith.constant 1 : index
    %c0_1 = arith.constant 0 : index
    %8 = vector.load %arg1[%c1, %c0_1] : memref<4x512xi32, #tpu.memory_space<vmem>>, vector<1x512xi32>
    %c8_i32 = arith.constant 8 : i32
    %9 = vector.broadcast %c8_i32 : i32 to vector<1x512xi32>
    %10 = arith.subi %8, %9 : vector<1x512xi32>
    %11 = tpu.iota {dimensions = array<i32: 0>} : vector<8x512xi32>
    %12 = vector.broadcast %10 : vector<1x512xi32> to vector<8x512xi32>
    %13 = arith.cmpi eq, %11, %12 : vector<8x512xi32>
    %14 = arith.extui %13 : vector<8x512xi1> to vector<8x512xi32>
    %15 = arith.sitofp %14 : vector<8x512xi32> to vector<8x512xf32>
    %c2 = arith.constant 2 : index
    %c0_2 = arith.constant 0 : index
    %16 = vector.load %arg1[%c2, %c0_2] : memref<4x512xi32, #tpu.memory_space<vmem>>, vector<1x512xi32>
    %c16_i32 = arith.constant 16 : i32
    %17 = vector.broadcast %c16_i32 : i32 to vector<1x512xi32>
    %18 = arith.subi %16, %17 : vector<1x512xi32>
    %19 = tpu.iota {dimensions = array<i32: 0>} : vector<16x512xi32>
    %20 = vector.broadcast %18 : vector<1x512xi32> to vector<16x512xi32>
    %21 = arith.cmpi eq, %19, %20 : vector<16x512xi32>
    %22 = arith.extui %21 : vector<16x512xi1> to vector<16x512xi32>
    %23 = arith.sitofp %22 : vector<16x512xi32> to vector<16x512xf32>
    %c3 = arith.constant 3 : index
    %c0_3 = arith.constant 0 : index
    %24 = vector.load %arg1[%c3, %c0_3] : memref<4x512xi32, #tpu.memory_space<vmem>>, vector<1x512xi32>
    %c32_i32 = arith.constant 32 : i32
    %25 = vector.broadcast %c32_i32 : i32 to vector<1x512xi32>
    %26 = arith.subi %24, %25 : vector<1x512xi32>
    %27 = tpu.iota {dimensions = array<i32: 0>} : vector<16x512xi32>
    %28 = vector.broadcast %26 : vector<1x512xi32> to vector<16x512xi32>
    %29 = arith.cmpi eq, %27, %28 : vector<16x512xi32>
    %30 = arith.extui %29 : vector<16x512xi1> to vector<16x512xi32>
    %31 = arith.sitofp %30 : vector<16x512xi32> to vector<16x512xf32>
    %32 = tpu.concatenate %7, %15, %23, %31 in 0 : vector<8x512xf32>, vector<8x512xf32>, vector<16x512xf32>, vector<16x512xf32> -> vector<48x512xf32>
    %33 = arith.truncf %32 : vector<48x512xf32> to vector<48x512xbf16>
    %c0_4 = arith.constant 0 : index
    %c0_5 = arith.constant 0 : index
    %34 = vector.load %arg2[%c0_4, %c0_5] : memref<34x48xbf16, #tpu.memory_space<vmem>>, vector<34x48xbf16>
    %cst = arith.constant dense<0.000000e+00> : vector<34x512xf32>
    %35 = tpu.matmul %34, %33, %cst {dimension_numbers = #tpu.dot_dimension_numbers<[1], [0], [0], [1], [0, 0, 1, 1], [], []>} : vector<34x48xbf16>, vector<48x512xbf16>, vector<34x512xf32> -> vector<34x512xf32>
    %36 = vector.extract_strided_slice %35 {offsets = [0, 0], sizes = [32, 512], strides = [1, 1]} : vector<34x512xf32> to vector<32x512xf32>
    %37 = vector.extract_strided_slice %35 {offsets = [32, 0], sizes = [1, 512], strides = [1, 1]} : vector<34x512xf32> to vector<1x512xf32>
    %38 = vector.extract_strided_slice %35 {offsets = [33, 0], sizes = [1, 512], strides = [1, 1]} : vector<34x512xf32> to vector<1x512xf32>
    %39 = arith.mulf %36, %36 : vector<32x512xf32>
    %cst_6 = arith.constant dense<0.000000e+00> : vector<512xf32>
    %40 = vector.multi_reduction <add>, %39, %cst_6 [0] : vector<32x512xf32> to vector<512xf32>
    %41 = vector.shape_cast %40 : vector<512xf32> to vector<1x512xf32>
    %42 = arith.subf %41, %37 : vector<1x512xf32>
    %cst_7 = arith.constant 5.000000e-01 : f32
    %43 = vector.broadcast %cst_7 : f32 to vector<1x512xf32>
    %44 = arith.mulf %43, %42 : vector<1x512xf32>
    %c0_8 = arith.constant 0 : index
    %45 = memref.load %arg3[%c0_8] : memref<1xf32, #tpu.memory_space<smem>>
    %46 = vector.broadcast %45 : f32 to vector<1x512xf32>
    %47 = arith.addf %38, %46 : vector<1x512xf32>
    %48 = arith.addf %47, %44 : vector<1x512xf32>
    %49 = arith.negf %48 : vector<1x512xf32>
    %50 = math.exp %49 : vector<1x512xf32>
    %cst_9 = arith.constant 1.000000e+00 : f32
    %51 = vector.broadcast %cst_9 : f32 to vector<1x512xf32>
    %52 = arith.addf %51, %50 : vector<1x512xf32>
    %53 = arith.divf %51, %52 : vector<1x512xf32>
    %c0_10 = arith.constant 0 : index
    %c0_11 = arith.constant 0 : index
    %54 = vector.load %arg4[%c0_10, %c0_11] : memref<1x512xf32, #tpu.memory_space<vmem>>, vector<1x512xf32>
    tpu.vector_store %arg4[%c0_10, %c0_11], %53 {strides = array<i32>} : memref<1x512xf32, #tpu.memory_space<vmem>>, vector<1x512xf32>,
    return
  }
  func.func @transform_0(%arg0: i32) -> (i32, i32) {
    %c0_i32 = arith.constant 0 : i32
    %c0_i32_0 = arith.constant 0 : i32
    return %c0_i32, %arg0 : i32, i32
  }
  func.func @transform_1(%arg0: i32) -> (i32, i32) {
    %c0_i32 = arith.constant 0 : i32
    %c0_i32_0 = arith.constant 0 : i32
    %c0_i32_1 = arith.constant 0 : i32
    return %c0_i32, %c0_i32_0 : i32, i32
  }
  func.func @transform_2(%arg0: i32) -> i32 {
    %c0_i32 = arith.constant 0 : i32
    %c0_i32_0 = arith.constant 0 : i32
    return %c0_i32 : i32
  }
  func.func @transform_3(%arg0: i32) -> (i32, i32) {
    %c0_i32 = arith.constant 0 : i32
    %c0_i32_0 = arith.constant 0 : i32
    return %c0_i32, %arg0 : i32, i32
  }
}

</mosaic_0001>

<bundles_post_ra>
// kernel: tpu_custom_call.1
= control target key start
LH: loop header
LB: loop body
LE: loop exit
PB: predicated region body
PF: predicated region fallthrough
CT: control target
= control target key end

     0   :  { %s1354_s0 = inlined_call_operand.hbm [shape: s32[4,1024], index: 0, kind: input, shape index: {}]   ;;  %s1355_s1 = inlined_call_operand.hbm [shape: bf16[34,48], index: 1, kind: input, shape index: {}]   ;;  %s1356_s2 = inlined_call_operand.<no memory space> [shape: f32[1], index: 2, kind: input, shape index: {}]   ;;  %s1357_s3 = inlined_call_operand.hbm [shape: f32[1,1024], index: 3, kind: output, shape index: {}]  }
   0x1   :  { %8 = sst [smem:[#allocation2]] %s1356_s2 }
   0x2   :  { %9 = vsyncpa [#allocation4], 0 }
   0x3   :  { %11 = vsyncpa [#allocation4 + $0x1], 0 }
   0x4   :  { %12 = vsyncpa [#allocation7], 0 }
   0x5   :  { %13 = vsyncpa [#allocation5], 0 }
   0x6   :  { %15 = vsyncpa [#allocation5 + $0x1], 0  ;;  %s1079_s14 = smov 0   ;;  %s1081_s15 = smov 0  }
   0x7   :  { %s1083_s16 = smov 0   ;;  %s1085_s17 = smov 0  }
   0x8 LB: > { %s1100_s2 = sadd.s32 4294967295, %s1046_s17   ;;  %s752_s18 = sadd.s32 4294967294, %s1046_s17   ;;  %s1046_s17 = sphi %s1085_s17, %s1387_s17   ;;  %s1042_s16 = sphi %s1083_s16, %s1386_s16   ;;  %s1038_s15 = sphi %s1081_s15, %s1385_s15   ;;  %s1034_s14 = sphi %s1079_s14, %s1384_s14  }
   0x9   : > { %p41_p0 = scmp.ne.s32.totalorder %s1038_s15, %s1034_s14  ;;  %p1358_p1 = scmp.eq.s32.totalorder %s1100_s2, 0 }
   0xa   : > { %p113_p3 = scmp.eq.s32.totalorder %s752_s18, 1  ;;  %p753_p5 = scmp.ge.s32.totalorder %s1046_s17, 1 }
   0xb   : > { %p1109_p4 = por %p1358_p1, %p41_p0  ;;  %p120_p7 = scmp.lt.s32.totalorder %s1046_s17, 3 }
   0xc   : > { %p1114_p6 = por %p113_p3, %p41_p0  ;;  %s1048_s22 = smov [#allocation6]  }
   0xd   : > { %s1361_s19 = scalar_select %p1109_p4, 1, 0 }
   0xe   : > { %s1362_s20 = scalar_select %p1114_p6, 1, 0 }
   0xf   : > { %p1119_p8 = pnand %p753_p5, %p120_p7  ;;  %s132_s23 = sshll.u32 %s1048_s22, 4  ;;  %s1123_s23 = int_to_ptr.vmem [resolvable:$true] %s132_s23 }
  0x10   : > { %s1135_s25 = sadd.s32 1, %s1046_s17   ;;  %s28_s26 = sadd.s32 1, %s1042_s16 }
  0x11   : > { %s1363_s21 = scalar_select %p1119_p8, 1, 0 }
  0x12   : > { %p845_p9 = pneg %p1119_p8  ;;  %s25_s27 = ssub.s32 %s1046_s17, %s1135_s25 }
  0x13   : > { %s918_s30 = scalar_lea.hbm %s1355_s1, 320 }
  0x14   : > { %p1130_p11 = pnand %p845_p9, %p1358_p1  ;;  %p919_p12 = scmp.ne.s32.totalorder %s1355_s1, %s918_s30 }
  0x15   : > { %p925_p5 = scmp.lt.u32.totalorder %s918_s30, %s1355_s1 }
  0x16   : > { %p920_p13 = pneg %p1130_p11 }
  0x18   : > { %p921_p0 = pnand %p920_p13, %p919_p12 }
  0x1a   : > { %p922_p3 = pneg %p921_p0 }
  0x1c   : > { %p927_p7 = pnand %p925_p5, %p922_p3 }
  0x1e   : > { %930 = shalt.err (!%p927_p7)
}
  0x1f   : > { %s931_s8 = scalar_lea.vmem %s1123_s23, 320  ;;  %p939_p2 = scmp.lt.s32.totalorder %s1123_s23, %s1123_s23 }
  0x20   : > { %p932_p9 = scmp.ne.s32.totalorder %s1123_s23, %s931_s8  ;;  %p940_p6 = scmp.lt.s32.totalorder %s931_s8, %s931_s8 }
  0x22   : > { %p934_p10 = pnand %p932_p9, %p920_p13  ;;  %p941_p4 = por %p940_p6, %p939_p2 }
  0x24   : > { %p935_p1 = pneg %p934_p10 }
  0x26   : > { %p942_p8 = pnand %p941_p4, %p935_p1 }
  0x28   : > { %945 = shalt.err (!%p942_p8)
}
  0x29   : > { %s1049_s9 = smov 64   ;;  %s1050_s10 = smov 4  }
  0x2a   : > { %848 = dma.hbm_to_vmem [thread:$0]  (!%p1130_p11), %s1355_s1, 320, %s1123_s23, [#allocation7], %s1049_s9, %s1049_s9, %s1050_s10  }
  0x2b   : > { %p26_p2 = scmp.eq.s32.totalorder %s25_s27, 0  ;;  %p35_p1 = scmp.ne.s32.totalorder %s1042_s16, %s1038_s15 }
  0x2c   : > { %p36_p4 = scmp.eq.s32.totalorder %s1046_s17, 0  ;;  %p858_p6 = scmp.lt.s32.totalorder %s1046_s17, 2 }
  0x2d   : > { %s1166_s13 = scalar_select %p26_p2, %s1042_s16, %s28_s26  }
  0x2e   : > { %p37_p8 = por %p36_p4, %p35_p1  ;;  %p1365_p10 = scmp.eq.s32.totalorder %s1100_s2, 1 }
  0x2f   : > { %s149_s22 = sand.u32 1, %s1042_s16   ;;  %s835_s28 = sshll.u32 %s1046_s17, 8 }
  0x30   : > { %p1170_p12 = por %p1365_p10, %p35_p1  ;;  %s756_s29 = sshll.u32 %s149_s22, 4 }
  0x31   : > { %s1179_s4 = scalar_lea.hbm %s1354_s0, %s835_s28  ;;  %s153_s23 = scalar_lea.vmem [#allocation3], %s756_s29 }
  0x32   : > { %s161_s26 = sshll.u32 %s153_s23, 4  ;;  %p1181_p11 = pnand %p858_p6, %p37_p8  ;;  %s1185_s26 = int_to_ptr.vmem [resolvable:$true] %s161_s26 }
  0x33   : > { %s150_s5 = scalar_lea.sflag [#allocation4], %s149_s22  ;;  %s946_s6 = scalar_lea.hbm %s1179_s4, 256 }
  0x34   : > { %p947_p13 = scmp.ne.s32.totalorder %s1179_s4, %s946_s6  ;;  %p948_p0 = pneg %p1181_p11 }
  0x35   : > { %s951_s9 = scalar_lea.hbm %s1354_s0, 512  ;;  %p952_p7 = scmp.lt.u32.totalorder %s1179_s4, %s1354_s0 }
  0x36   : > { %p949_p3 = pnand %p948_p0, %p947_p13  ;;  %p953_p9 = scmp.lt.u32.totalorder %s951_s9, %s946_s6 }
  0x37   : > { %p955_p1 = scmp.lt.u32.totalorder %s946_s6, %s1179_s4 }
  0x38   : > { %p950_p5 = pneg %p949_p3  ;;  %p954_p2 = por %p953_p9, %p952_p7 }
  0x3a   : > { %p956_p4 = por %p955_p1, %p954_p2 }
  0x3c   : > { %p957_p6 = pnand %p956_p4, %p950_p5 }
  0x3e   : > { %960 = shalt.err (!%p957_p6)
}
  0x3f   : > { %s961_s12 = scalar_lea.vmem %s1185_s26, 256  ;;  %s1051_s22 = smov [#allocation3]  }
  0x40   : > { %p962_p8 = scmp.ne.s32.totalorder %s1185_s26, %s961_s12  ;;  %s966_s28 = sshll.u32 %s1051_s22, 4  ;;  %s967_s28 = int_to_ptr.vmem [resolvable:$false] %s966_s28 }
  0x41   : > { %s968_s29 = scalar_lea.vmem %s967_s28, 512  ;;  %p969_p3 = scmp.lt.s32.totalorder %s1185_s26, %s967_s28 }
  0x42   : > { %p964_p10 = pnand %p962_p8, %p948_p0  ;;  %p970_p7 = scmp.lt.s32.totalorder %s968_s29, %s961_s12 }
  0x44   : > { %p965_p13 = pneg %p964_p10  ;;  %p971_p9 = por %p970_p7, %p969_p3 }
  0x46   : > { %p972_p2 = pnand %p971_p9, %p965_p13 }
  0x48   : > { %975 = shalt.err (!%p972_p2)
}
  0x49   : > { %852 = dma.hbm_to_vmem [thread:$0]  (!%p1181_p11), %s1179_s4, 256, %s1185_s26, %s150_s5  }
  0x4a   : > { %p1368_p5 = scmp.ne.s32.totalorder %s1363_s21, 0 }
  0x4b   : > { %s1215_s24 = sand.u32 (!%p1368_p5), 1, %s1038_s15   ;;  %p1369_p0 = scmp.ne.s32.totalorder (!%p1368_p5), %s1361_s19, 0 }
  0x4c   : > { %170 = sbr.rel (%p1368_p5) target bundleno = 408 (0x198), region = 32  ;;  %s760_s30 = sshll.u32 (!%p1368_p5), %s1215_s24, 4 }
  0x4d   : > { %s173_s23 = scalar_lea.sflag (!%p1368_p5), [#allocation4], %s1215_s24  ;;  %s1219_s6 = scalar_lea.vmem (!%p1368_p5), [#allocation3], %s760_s30 }
  0x53   : > { %1021 = dma.done.wait (%p1369_p0), %s173_s23, 256  }
  0x54   : > { %1023 = vsyncadd (%p1369_p0), %s173_s23, 4294967040  ;;  %p1370_p11 = scmp.eq.s32.totalorder %s1100_s2, 0 }
  0x56   : > { %1025 = dma.done.wait (%p1370_p11), [#allocation7], 320   ;;  %p1371_p1 = pmov %p1370_p11 }
  0x57   : > { %v207_v0 = vlaneseq  ;;  %v1052_v1 = vmov 0   ;;  %v206_v7 = vld [vmem:[%s1219_s6] ss:$4 sm:$0xf]  ;;  %v1053_v31 = vmov 1.0|1.0  }
  0x58   : > { %1027 = vsyncadd (%p1371_p1), [#allocation7], 4294966976  ;;  %427 = vmatprep.mubr.bf16.mxu0 %v1052_v1  ;;  %488 = vmatprep.mubr.bf16.mxu1 %v1052_v1  ;;  %v767_v8 = vld [vmem:[%s1219_s6 + $0x1] ss:$4 sm:$0xf]  ;;  %s577_s19 = sld [smem:[#allocation2]] }
  0x59   : > { %v1232_v2 = vshrl.u32 %v207_v0, 7  ;;  %v768_v10 = vadd.s32 4294967288, %v767_v8  ;;  %v773_v13 = vld [vmem:[%s1219_s6 + $0x2] ss:$4 sm:$0xf]  ;;  %s762_s21 = sshll.u32 %s1215_s24, 2 }
  0x5a   : > { %v774_v15 = vadd.s32 4294967280, %v773_v13  ;;  %v783_v30 = vld [vmem:[%s1219_s6 + $0x3] ss:$4 sm:$0xf]  ;;  %s836_s4 = sshll.u32 %s1100_s2, 6  ;;  %s202_s26 = scalar_lea.vmem [#allocation8], %s762_s21 }
  0x5b   : > { %v215_v3 = vsub.s32 1, %v1232_v2  ;;  %v223_v4 = vsub.s32 3, %v1232_v2  ;;  %v211_v5 = vsub.s32 0, %v1232_v2  ;;  %v219_v6 = vsub.s32 2, %v1232_v2  ;;  %v899_v37 = vld [vmem:[#allocation6] sm:$0xff]   ;;  %v900_v38 = vld [vmem:[#allocation6 + $0x8] sm:$0xff]   ;;  %s1310_s8 = scalar_lea.hbm %s1357_s3, %s836_s4 }
  0x5c   : > { %v1242_v16 = vadd.s32 8, %v1232_v2  ;;  %v784_v32 = vadd.s32 4294967264, %v783_v30  ;;  %v901_v39 = vld [vmem:[#allocation6 + $0x10] ss:$0 sps:$4 sm:$0x11]   ;;  %s672_s27 = sshll.u32 %s202_s26, 4  ;;  %s1312_s27 = int_to_ptr.vmem [resolvable:$true] %s672_s27 }
  0x5d   : > { %v216_v9 = vrot.slane %v206_v7, %v215_v3  ;;  %v224_v11 = vrot.slane %v206_v7, %v223_v4  ;;  %v212_v12 = vrot.slane %v206_v7, %v211_v5  ;;  %v220_v14 = vrot.slane %v206_v7, %v219_v6  ;;  %s658_s9 = scalar_lea.sflag [#allocation5], %s1215_s24  ;;  %s976_s10 = scalar_lea.vmem %s1312_s27, 64 }
  0x5e   : > { %v247_v18 = vrot.slane %v768_v10, %v215_v3  ;;  %v255_v20 = vrot.slane %v768_v10, %v223_v4  ;;  %v243_v22 = vrot.slane %v768_v10, %v211_v5  ;;  %v251_v24 = vrot.slane %v768_v10, %v219_v6  ;;  %p977_p4 = scmp.ne.s32.totalorder %s1312_s27, %s976_s10  ;;  %s1055_s2 = smov [#allocation8]  }
  0x5f   : > { %vm1245_vm0 = vcmp.eq.s32.totalorder %v1232_v2, %v216_v9  ;;  %vm1250_vm1 = vcmp.eq.s32.totalorder %v1232_v2, %v224_v11  ;;  %vm1255_vm2 = vcmp.eq.s32.totalorder %v1232_v2, %v212_v12  ;;  %vm1260_vm3 = vcmp.eq.s32.totalorder %v1232_v2, %v220_v14  ;;  %s980_s11 = sshll.u32 %s1055_s2, 4  ;;  %s981_s11 = int_to_ptr.vmem [resolvable:$false] %s980_s11 }
  0x60   : > { %vm257_vm4 = vcmp.eq.s32.totalorder %v1232_v2, %v247_v18  ;;  %vm259_vm5 = vcmp.eq.s32.totalorder %v1232_v2, %v255_v20  ;;  %v279_v25 = vrot.slane %v774_v15, %v215_v3  ;;  %v287_v26 = vrot.slane %v774_v15, %v223_v4  ;;  %p978_p6 = pnand %p977_p4, %p1170_p12  ;;  %s982_s12 = scalar_lea.vmem %s981_s11, 128 }
  0x61   : > { %vm796_vm6 = vmpackc.low %vm257_vm4, %vm1245_vm0  ;;  %vm256_vm7 = vcmp.eq.s32.totalorder %v1232_v2, %v243_v22  ;;  %vm1270_vm8 = vcmp.eq.s32.totalorder %v1232_v2, %v251_v24  ;;  %v275_v28 = vrot.slane %v774_v15, %v211_v5  ;;  %v283_v29 = vrot.slane %v774_v15, %v219_v6  ;;  %p983_p10 = scmp.lt.s32.totalorder %s1312_s27, %s981_s11  ;;  %p984_p13 = scmp.lt.s32.totalorder %s982_s12, %s976_s10 }
  0x62   : > { %797 = vmatprep.subr.msk.bf16.mxu0 %vm796_vm6, %v1053_v31  ;;  %vm811_vm9 = vmpackc.low %vm259_vm5, %vm1250_vm1  ;;  %vm289_vm10 = vcmp.eq.s32.totalorder %v1232_v2, %v279_v25  ;;  %vm293_vm11 = vcmp.eq.s32.totalorder %v1242_v16, %v279_v25  ;;  %vm291_vm13 = vcmp.eq.s32.totalorder %v1232_v2, %v287_v26  ;;  %vm295_vm14 = vcmp.eq.s32.totalorder %v1242_v16, %v287_v26  ;;  %p979_p8 = pneg %p978_p6 }
  0x63   : > { %812 = vmatprep.subr.msk.bf16.mxu1 %vm811_vm9, %v1053_v31  ;;  %vm798_vm12 = vmpackc.low %vm256_vm7, %vm1255_vm2  ;;  %vm288_vm0 = vcmp.eq.s32.totalorder %v1232_v2, %v275_v28  ;;  %vm292_vm1 = vcmp.eq.s32.totalorder %v1242_v16, %v275_v28  ;;  %vm290_vm5 = vcmp.eq.s32.totalorder %v1232_v2, %v283_v29  ;;  %vm294_vm2 = vcmp.eq.s32.totalorder %v1242_v16, %v283_v29  ;;  %p985_p3 = por %p984_p13, %p983_p10 }
  0x64   : > { %799 = vmatpush1.bf16.msk.msra.mxu0 %vm798_vm12, %v1053_v31  ;;  %vm813_vm15 = vmpackc.low %vm1270_vm8, %vm1260_vm3  ;;  %v322_v33 = vrot.slane %v784_v32, %v215_v3  ;;  %v330_v34 = vrot.slane %v784_v32, %v223_v4  ;;  %v318_v35 = vrot.slane %v784_v32, %v211_v5  ;;  %v326_v36 = vrot.slane %v784_v32, %v219_v6 }
  0x65   : > { %814 = vmatpush1.bf16.msk.msra.mxu1 %vm813_vm15, %v1053_v31  ;;  %vm800_vm4 = vmpackc.low %vm293_vm11, %vm289_vm10  ;;  %p986_p7 = pnand %p985_p3, %p979_p8 }
  0x66   : > { %801 = vmatprep.subr.msk.bf16.mxu0 %vm800_vm4, %v1053_v31  ;;  %vm815_vm6 = vmpackc.low %vm295_vm14, %vm291_vm13  ;;  %vm332_vm8 = vcmp.eq.s32.totalorder %v1232_v2, %v322_v33  ;;  %vm336_vm9 = vcmp.eq.s32.totalorder %v1242_v16, %v322_v33  ;;  %vm334_vm10 = vcmp.eq.s32.totalorder %v1232_v2, %v330_v34  ;;  %vm338_vm11 = vcmp.eq.s32.totalorder %v1242_v16, %v330_v34 }
  0x67   : > { %816 = vmatprep.subr.msk.bf16.mxu1 %vm815_vm6, %v1053_v31  ;;  %vm802_vm7 = vmpackc.low %vm292_vm1, %vm288_vm0  ;;  %vm331_vm13 = vcmp.eq.s32.totalorder %v1232_v2, %v318_v35  ;;  %vm335_vm14 = vcmp.eq.s32.totalorder %v1242_v16, %v318_v35  ;;  %vm333_vm15 = vcmp.eq.s32.totalorder %v1232_v2, %v326_v36  ;;  %vm337_vm0 = vcmp.eq.s32.totalorder %v1242_v16, %v326_v36 }
  0x68   : > { %803 = vmatpush1.bf16.msk.msra.mxu0 %vm802_vm7, %v1053_v31  ;;  %vm817_vm3 = vmpackc.low %vm294_vm2, %vm290_vm5  ;;  %vm385_vm2 = vcmask 392192   ;;  %vm654_vm6 = vcmp.lt.s32.totalorder %v207_v0, 512 }
  0x69   : > { %818 = vmatpush1.bf16.msk.msra.mxu1 %vm817_vm3, %v1053_v31  ;;  %vm804_vm12 = vmpackc.low %vm336_vm9, %vm332_vm8 }
  0x6a   : > { %805 = vmatprep.subr.msk.bf16.mxu0 %vm804_vm12, %v1053_v31  ;;  %vm819_vm1 = vmpackc.low %vm338_vm11, %vm334_vm10 }
  0x6b   : > { %820 = vmatprep.subr.msk.bf16.mxu1 %vm819_vm1, %v1053_v31  ;;  %vm806_vm4 = vmpackc.low %vm335_vm14, %vm331_vm13 }
  0x6c   : > { %807 = vmatpush1.bf16.msk.msra.mxu0 %vm806_vm4, %v1053_v31  ;;  %vm821_vm5 = vmpackc.low %vm337_vm0, %vm333_vm15 }
  0x6d   : > { %822 = vmatpush1.bf16.msk.msra.mxu1 %vm821_vm5, %v1053_v31 }
  0x6f   : > { %808 = vmatmul.mubr.msk.bf16.vlgmr.msra.gmra.mrb[0].mxu0 %vm385_vm2, %v899_v37 }
  0x70   : > { %823 = vmatmul.mubr.msk.bf16.vlgmr.msra.gmra.mrb[0].mxu1 %vm385_vm2, %v899_v37  ;;  %437 = vmatprep.mubr.bf16.mxu0 %v1052_v1 }
  0x71   : > { %498 = vmatprep.mubr.bf16.mxu1 %v1052_v1 }
  0x77   : > { %809 = vmatmul.mubr.msk.bf16.gmra.mrb[4].mxu0 %vm385_vm2, %v900_v38 }
  0x78   : > { %824 = vmatmul.mubr.msk.bf16.gmra.mrb[4].mxu1 %vm385_vm2, %v900_v38  ;;  %447 = vmatprep.mubr.bf16.mxu0 %v1052_v1 }
  0x79   : > { %508 = vmatprep.mubr.bf16.mxu1 %v1052_v1 }
  0x7f   : > { %810 = vmatmul.mubr.msk.bf16.gmra.mrb[8].mxu0 %vm385_vm2, %v901_v39 }
  0x80   : > { %825 = vmatmul.mubr.msk.bf16.gmra.mrb[8].mxu1 %vm385_vm2, %v901_v39 }
 0x142   : > { %v429_v40 = vpop.f32.mrb[0].mxu0 }
 0x143   : > { %v490_v41 = vpop.f32.mrb[0].mxu1  ;;  %v431_v42 = vpop.f32.mrb[1].mxu0  ;;  %v517_v45 = vmul.f32 %v429_v40, %v429_v40 }
 0x144   : > { %v492_v43 = vpop.f32.mrb[1].mxu1  ;;  %v433_v44 = vpop.f32.mrb[2].mxu0  ;;  %v519_v49 = vmul.f32 %v490_v41, %v490_v41  ;;  %v518_v50 = vmul.f32 %v431_v42, %v431_v42 }
 0x145   : > { %v521_v46 = vmul.f32 %v433_v44, %v433_v44  ;;  %v494_v47 = vpop.f32.mrb[2].mxu1  ;;  %v435_v48 = vpop.f32.mrb[3].mxu0  ;;  %v520_v54 = vmul.f32 %v492_v43, %v492_v43 }
 0x146   : > { %v523_v51 = vmul.f32 %v494_v47, %v494_v47  ;;  %v522_v52 = vmul.f32 %v435_v48, %v435_v48  ;;  %v496_v53 = vpop.f32.mrb[3].mxu1 }
 0x147   : > { %v533_v55 = vadd.f32 %v521_v46, %v517_v45  ;;  %v524_v56 = vmul.f32 %v496_v53, %v496_v53 }
 0x148   : > { %v551_v57 = vadd.f32 %v523_v51, %v519_v49  ;;  %v542_v58 = vadd.f32 %v522_v52, %v518_v50 }
 0x149   : > { %v560_v59 = vadd.f32 %v524_v56, %v520_v54 }
 0x14a   : > { %v439_v60 = vpop.f32.mrb[4].mxu0 }
 0x14b   : > { %v525_v61 = vmul.f32 %v439_v60, %v439_v60  ;;  %v500_v62 = vpop.f32.mrb[4].mxu1  ;;  %v441_v63 = vpop.f32.mrb[5].mxu0 }
 0x14c   : > { %v527_v1 = vmul.f32 %v500_v62, %v500_v62  ;;  %v526_v3 = vmul.f32 %v441_v63, %v441_v63  ;;  %v502_v4 = vpop.f32.mrb[5].mxu1  ;;  %v443_v5 = vpop.f32.mrb[6].mxu0 }
 0x14d   : > { %v534_v6 = vadd.f32 %v533_v55, %v525_v61  ;;  %v528_v7 = vmul.f32 %v502_v4, %v502_v4  ;;  %v529_v8 = vmul.f32 %v443_v5, %v443_v5  ;;  %v504_v9 = vpop.f32.mrb[6].mxu1  ;;  %v445_v10 = vpop.f32.mrb[7].mxu0  ;;  %v578_v55 = vstv %s577_s19 }
 0x14e   : > { %v552_v11 = vadd.f32 %v551_v57, %v527_v1  ;;  %v543_v12 = vadd.f32 %v542_v58, %v526_v3  ;;  %v531_v13 = vmul.f32 %v504_v9, %v504_v9  ;;  %v530_v14 = vmul.f32 %v445_v10, %v445_v10  ;;  %v506_v15 = vpop.f32.mrb[7].mxu1 }
 0x14f   : > { %v561_v16 = vadd.f32 %v560_v59, %v528_v7  ;;  %v535_v17 = vadd.f32 %v534_v6, %v529_v8  ;;  %v532_v18 = vmul.f32 %v506_v15, %v506_v15 }
 0x150   : > { %v553_v19 = vadd.f32 %v552_v11, %v531_v13  ;;  %v544_v20 = vadd.f32 %v543_v12, %v530_v14 }
 0x151   : > { %v536_v21 = vrot.slane %v535_v17, 4  ;;  %v562_v22 = vadd.f32 %v561_v16, %v532_v18 }
 0x152   : > { %v554_v23 = vrot.slane %v553_v19, 4  ;;  %v545_v24 = vrot.slane %v544_v20, 4  ;;  %v449_v25 = vpop.f32.mrb[8].mxu0 }
 0x153   : > { %v537_v26 = vadd.f32 %v536_v21, %v535_v17  ;;  %v563_v27 = vrot.slane %v562_v22, 4  ;;  %v510_v28 = vpop.f32.mrb[8].mxu1  ;;  %v451_v29 = vpop.f32.mrb[9].mxu0  ;;  %v579_v62 = vadd.f32 %v578_v55, %v449_v25 }
 0x154   : > { %v555_v30 = vadd.f32 %v554_v23, %v553_v19  ;;  %v546_v31 = vadd.f32 %v545_v24, %v544_v20  ;;  %v512_v32 = vpop.f32.mrb[9].mxu1  ;;  %v453_v33 = vpop.f32.mrb[10].mxu0  ;;  %v581_v3 = vadd.f32 %v578_v55, %v510_v28  ;;  %v580_v5 = vadd.f32 %v578_v55, %v451_v29 }
 0x155   : > { %v538_v34 = vrot.slane %v537_v26, 2  ;;  %v564_v35 = vadd.f32 %v563_v27, %v562_v22  ;;  %v514_v36 = vpop.f32.mrb[10].mxu1  ;;  %v454_v37 = vpop.f32.mrb[11].mxu0  ;;  %v582_v8 = vadd.f32 %v578_v55, %v512_v32 }
 0x156   : > { %v556_v38 = vrot.slane %v555_v30, 2  ;;  %v547_v39 = vrot.slane %v546_v31, 2  ;;  %v515_v40 = vpop.f32.mrb[11].mxu1 }
 0x157   : > { %v565_v41 = vrot.slane %v564_v35, 2  ;;  %v539_v42 = vadd.f32 %v538_v34, %v537_v26 }
 0x158   : > { %v557_v43 = vadd.f32 %v556_v38, %v555_v30  ;;  %v548_v44 = vadd.f32 %v547_v39, %v546_v31 }
 0x159   : > { %v540_v45 = vrot.slane %v539_v42, 1  ;;  %v566_v46 = vadd.f32 %v565_v41, %v564_v35 }
 0x15a   : > { %v558_v47 = vrot.slane %v557_v43, 1  ;;  %v549_v48 = vrot.slane %v548_v44, 1 }
 0x15b   : > { %v541_v49 = vadd.f32 %v540_v45, %v539_v42  ;;  %v567_v50 = vrot.slane %v566_v46, 1 }
 0x15c   : > { %v559_v51 = vadd.f32 %v558_v47, %v557_v43  ;;  %v550_v52 = vadd.f32 %v549_v48, %v548_v44 }
 0x15d   : > { %v569_v53 = vsub.f32 %v541_v49, %v449_v25  ;;  %v568_v54 = vadd.f32 %v567_v50, %v566_v46  ;;  %v1054_v25 = vmov 1966171168  }
 0x15e   : > { %v571_v56 = vsub.f32 %v559_v51, %v510_v28  ;;  %v570_v57 = vsub.f32 %v550_v52, %v451_v29  ;;  %v630_v26 = vunpack.c.l.s4 %v1054_v25 }
 0x15f   : > { %v573_v58 = vmul.f32 0.5, %v569_v53  ;;  %v572_v59 = vsub.f32 %v568_v54, %v512_v32 }
 0x160   : > { %v575_v60 = vmul.f32 0.5, %v571_v56  ;;  %v574_v61 = vmul.f32 0.5, %v570_v57  ;;  %v631_v27 = vunpack.c.0.s8 %v630_v26 }
 0x161   : > { %v587_v63 = vrot.slane %v573_v58, 7  ;;  %v576_v1 = vmul.f32 0.5, %v572_v59 }
 0x162   : > { %v589_v4 = vrot.slane %v575_v60, 7  ;;  %v588_v6 = vrot.slane %v574_v61, 7  ;;  %v634_v30 = vsub.s32 %v631_v27, %v1232_v2 }
 0x163   : > { %v595_v7 = vadd.f32 %v587_v63, %v579_v62  ;;  %v590_v9 = vrot.slane %v576_v1, 7 }
 0x164   : > { %v597_v10 = vadd.f32 %v589_v4, %v581_v3  ;;  %v596_v11 = vadd.f32 %v588_v6, %v580_v5 }
 0x165   : > { %v826_v12 = vmul.f32 -1.442695, %v595_v7  ;;  %v598_v13 = vadd.f32 %v590_v9, %v582_v8 }
 0x166   : > { %v828_v14 = vmul.f32 -1.442695, %v597_v10  ;;  %v827_v15 = vmul.f32 -1.442695, %v596_v11 }
 0x167   : > { %902 = vpow2.f32 %v826_v12  ;;  %v829_v16 = vmul.f32 -1.442695, %v598_v13 }
 0x168   : > { %904 = vpow2.f32 %v828_v14 }
 0x169   : > { %906 = vpow2.f32 %v827_v15 }
 0x16a   : > { %908 = vpow2.f32 %v829_v16 }
 0x171   : > { %v903_v17 = vpop.eup %902 }
 0x172   : > { %v905_v18 = vpop.eup %904  ;;  %v611_v19 = vadd.f32 1.0, %v903_v17 }
 0x173   : > { %v907_v20 = vpop.eup %906  ;;  %v613_v21 = vadd.f32 1.0, %v905_v18 }
 0x174   : > { %v909_v22 = vpop.eup %908  ;;  %910 = vrcp.f32 %v611_v19  ;;  %v612_v23 = vadd.f32 1.0, %v907_v20 }
 0x175   : > { %912 = vrcp.f32 %v613_v21  ;;  %v614_v24 = vadd.f32 1.0, %v909_v22 }
 0x176   : > { %914 = vrcp.f32 %v612_v23 }
 0x177   : > { %916 = vrcp.f32 %v614_v24 }
 0x17e   : > { %v911_v28 = vpop.eup %910 }
 0x17f   : > { %v913_v29 = vpop.eup %912 }
 0x180   : > { %v915_v31 = vpop.eup %914 }
 0x181   : > { %v917_v32 = vpop.eup %916  ;;  %v627_v33 = vcombine.low %v911_v28, %v915_v31 }
 0x182   : > { %v628_v34 = vcombine.low %v913_v29, %v917_v32 }
 0x183   : > { %v635_v35 = vrot.slane %v627_v33, %v634_v30 }
 0x184   : > { %v642_v36 = vrot.slane %v628_v34, %v634_v30 }
 0x186   : > { %v643_v37 = vcombine.high %v635_v35, %v642_v36 }
 0x188   : > { %v650_v38 = vrot.slane %v643_v37, %v634_v30 }
 0x18a   : > { %656 = vst.msk [vmem:[%s202_s26] sm:$0xf] %vm654_vm6, %v650_v38 }
 0x18b   : > { %989 = shalt.err (!%p986_p7)
}
 0x18c   : > { %s990_s22 = scalar_lea.hbm %s1310_s8, 64  ;;  %s994_s24 = scalar_lea.hbm %s1357_s3, 128 }
 0x18d   : > { %p991_p9 = scmp.ne.s32.totalorder %s1310_s8, %s990_s22  ;;  %p995_p0 = scmp.lt.u32.totalorder %s1310_s8, %s1357_s3 }
 0x18e   : > { %p996_p11 = scmp.lt.u32.totalorder %s994_s24, %s990_s22  ;;  %p998_p4 = scmp.lt.u32.totalorder %s990_s22, %s1310_s8 }
 0x18f   : > { %p992_p2 = pnand %p991_p9, %p1170_p12 }
 0x190   : > { %p997_p1 = por %p996_p11, %p995_p0 }
 0x191   : > { %p993_p5 = pneg %p992_p2 }
 0x192   : > { %p999_p6 = por %p998_p4, %p997_p1 }
 0x194   : > { %p1000_p8 = pnand %p999_p6, %p993_p5 }
 0x196   : > { %1003 = shalt.err (!%p1000_p8)
}
 0x197   : > { %843 = dma.vmem_to_hbm [thread:$0]  (%p1170_p12), %s1312_s27, 64, %s1310_s8, %s658_s9  }
 0x198 PF: > { %s684_s6 = sand.u32 1, %s1034_s14   ;;  %p1382_p10 = scmp.ne.s32.totalorder %s1362_s20, 0 }
 0x199   : > { %p1383_p13 = scmp.ge.s32.totalorder %s1046_s17, 2  ;;  %s685_s19 = scalar_lea.sflag [#allocation5], %s684_s6 }
 0x19b   : > { %p854_p3 = pnand %p1383_p13, %p1382_p10 }
 0x19d   : > { %1029 = dma.done.wait (!%p854_p3), %s685_s19, 64  }
 0x19e   : > { %1031 = vsyncadd (!%p854_p3), %s685_s19, 4294967232  ;;  %p18_p7 = scmp.ge.s32.totalorder %s1135_s25, 4   ;;  %s1384_s14 = smov %s1038_s15 }
 0x19f   : > { %s1385_s15 = smov %s1042_s16  ;;  %s1386_s16 = smov %s1166_s13 }
 0x1a0   : > { %s1387_s17 = smov %s1135_s25  ;;  %20 = sbr.rel (!%p18_p7) target bundleno = 8 (0x8), region = 84 }
 0x1a7   :  { %690 = vsyncpa [#allocation4], 1 }
 0x1a8   :  { %692 = vsyncpa [#allocation4 + $0x1], 1 }
 0x1a9   :  { %693 = vsyncpa [#allocation7], 1 }
 0x1aa   :  { %694 = vsyncpa [#allocation5], 1 }
 0x1ab   :  { %696 = vsyncpa [#allocation5 + $0x1], 1 }

</bundles_post_ra>
